<compile_context>
chip_gen: v7x
topology: tpu7x:2x2x1
jax: 0.10.0
libtpu: 0.0.40
codegen_flags: <defaults>
</compile_context>

<pallas_src>
import math

import numpy as np
import jax
import jax.numpy as jnp
from jax.experimental import pallas as pl
from jax.experimental.pallas import tpu as pltpu


# ----------------------------------------------------------------------------
# Config helpers (mirrors the PyTorch LMAConfigRL logic)
# ----------------------------------------------------------------------------
def find_closest_divisor(total_value: int, target_divisor: int, max_delta: int = 100) -> int:
    if total_value % target_divisor == 0:
        return target_divisor
    for delta in range(1, max_delta + 1):
        cand = target_divisor - delta
        if cand > 0 and total_value % cand == 0:
            return cand
        cand = target_divisor + delta
        if total_value % cand == 0:
            return cand
    return total_value


# ----------------------------------------------------------------------------
# Positional encoding (same as the PyTorch _positional_encoding)
# ----------------------------------------------------------------------------
def positional_encoding(seq_len: int, embed_dim: int) -> jnp.ndarray:
    position = jnp.arange(seq_len, dtype=jnp.float32)[:, None]
    div_term = jnp.exp(
        jnp.arange(0, embed_dim, 2, dtype=jnp.float32) * (-math.log(10000.0) / embed_dim)
    )
    pe = jnp.zeros((seq_len, embed_dim), dtype=jnp.float32)
    pe = pe.at[:, 0::2].set(jnp.sin(position * div_term))
    pe = pe.at[:, 1::2].set(jnp.cos(position * div_term))
    return pe


def _pick_batch_block(B: int, max_bt: int = 512) -> int:
    """Batch block Bt: all of B when tiny; else a multiple of 8 giving >=2 steps."""
    if B <= 8:
        return B
    return min(max_bt, ((B + 1) // 2 + 7) // 8 * 8)


# ----------------------------------------------------------------------------
# Fused forward pass (single pallas_call, batch-blocked grid)
# ----------------------------------------------------------------------------
def lma_initial_transform_forward(x, params, cfg):
    """x: (B, L, F) float32 -> z: (B, L_new, d_new) float32."""
    B, L, F = x.shape
    D = cfg["embed_dim"]
    nh = cfg["num_heads_stacking"]
    dk = D // nh
    L_new, C_new, d_new = cfg["L_new"], cfg["C_new"], cfg["d_new"]
    LF, LD, Nout = L * F, L * D, L_new * d_new

    w1, b1, w2, b2 = params["w1"], params["b1"], params["w2"], params["b2"]

    # ---- host-precomputed effective weights (exact 0 / copy folds) ----------
    pe_flat = positional_encoding(L, D).reshape(1, LD)            # [l*D+d] = pe[l,d]

    # Per-timestep Linear as a block-diagonal matmul on the flattened sample.
    w1_eff = jnp.kron(jnp.eye(L, dtype=jnp.float32), w1)          # (L*F, L*D)
    b1_eff = jnp.tile(b1.reshape(-1), L).reshape(1, LD)           # [l*D+d] = b1[d]

    # Head-stack + rechunk permutation folded into Stage-2 weights:
    #   flat y index p = l*D + h*dk + j  -> stacked/flattened position
    #   q = h*L*dk + l*dk + j  -> rechunked row m = q // C_new, col c = q % C_new,
    # so Stage-2 is y_flat @ W2_eff with W2_eff[p, m*d_new:(m+1)*d_new] = w2[c, :].
    # Handles the general case (no C_new % dk restriction).
    p_idx = np.arange(LD)
    l_idx, r_idx = p_idx // D, p_idx % D
    h_idx, j_idx = r_idx // dk, r_idx % dk
    q_idx = h_idx * (L * dk) + l_idx * dk + j_idx
    m_idx, c_idx = q_idx // C_new, q_idx % C_new
    w2_eff = jnp.zeros((LD, L_new, d_new), jnp.float32)
    w2_eff = w2_eff.at[p_idx, m_idx, :].set(w2[c_idx, :])
    w2_eff = w2_eff.reshape(LD, Nout)
    b2_eff = jnp.tile(b2.reshape(-1), L_new).reshape(1, Nout)     # [m*d_new+n] = b2[n]

    # ---- batch-blocked, lane-dense input / output ----------------------------
    Bt = _pick_batch_block(B)
    n_steps = pl.cdiv(B, Bt)
    B_pad = n_steps * Bt
    x_flat = x.reshape(B, LF)                                     # free HBM view
    if B_pad != B:
        x_flat = jnp.pad(x_flat, ((0, B_pad - B), (0, 0)))

    def kernel(x_ref, w1_ref, b1_ref, pe_ref, w2_ref, b2_ref, o_ref):
        # Stage 1: block-diagonal Linear + bias + ReLU + positional encoding.
        y = jnp.dot(x_ref[...], w1_ref[...], preferred_element_type=jnp.float32)
        y = jnp.maximum(y + b1_ref[...], 0.0) + pe_ref[...]       # (Bt, L*D)
        # (embedding dropout with p=0.0 is the identity)
        # Stage 2: permutation + latent Linear folded into W2_eff, then ReLU.
        z = jnp.dot(y, w2_ref[...], preferred_element_type=jnp.float32)
        o_ref[...] = jnp.maximum(z + b2_ref[...], 0.0)            # (Bt, L_new*d_new)

    out_flat = pl.pallas_call(
        kernel,
        out_shape=jax.ShapeDtypeStruct((B_pad, Nout), jnp.float32),
        grid=(n_steps,),
        in_specs=[
            pl.BlockSpec((Bt, LF), lambda b: (b, 0)),             # x block per step
            pl.BlockSpec((LF, LD), lambda b: (0, 0)),             # W1_eff resident
            pl.BlockSpec((1, LD), lambda b: (0, 0)),              # b1_eff resident
            pl.BlockSpec((1, LD), lambda b: (0, 0)),              # pe resident
            pl.BlockSpec((LD, Nout), lambda b: (0, 0)),           # W2_eff resident
            pl.BlockSpec((1, Nout), lambda b: (0, 0)),            # b2_eff resident
        ],
        out_specs=pl.BlockSpec((Bt, Nout), lambda b: (b, 0)),     # lane-dense output
        compiler_params=pltpu.CompilerParams(
            dimension_semantics=("parallel",),                    # megacore-ready
        ),
    )(x_flat, w1_eff, b1_eff, pe_flat, w2_eff, b2_eff)

    return out_flat[:B].reshape(B, L_new, d_new)


# ----------------------------------------------------------------------------
# Pure-JAX reference for sanity checking
# ----------------------------------------------------------------------------
def lma_initial_transform_reference(x, params, cfg):
    B, L, F = x.shape
    D = cfg["embed_dim"]
    nh = cfg["num_heads_stacking"]
    dk = D // nh
    L_new, C_new = cfg["L_new"], cfg["C_new"]
    pe = positional_encoding(L, D)
    y = jnp.maximum(x @ params["w1"] + params["b1"][0], 0.0) + pe[None]
    x_stacked = y.reshape(B, L, nh, dk).transpose(0, 2, 1, 3)     # (B, nh, L, dk)
    x_rechunked = x_stacked.reshape(B, L_new, C_new)
    z = jnp.maximum(x_rechunked @ params["w2"] + params["b2"][0], 0.0)
    return z


# ----------------------------------------------------------------------------
# Main
# ----------------------------------------------------------------------------
if __name__ == "__main__":
    # Small, module-consistent shapes
    B = 2
    seq_len = 8
    features_per_step = 16
    embed_dim = 32
    num_heads_stacking = 4
    target_l_new = 16
    d_new = 32

    total_features = seq_len * embed_dim                          # 256
    L_new = find_closest_divisor(total_features, target_l_new)    # 16
    C_new = total_features // L_new                               # 16

    cfg = dict(
        seq_len=seq_len,
        embed_dim=embed_dim,
        num_heads_stacking=num_heads_stacking,
        L_new=L_new,
        C_new=C_new,
        d_new=d_new,
    )

    key = jax.random.PRNGKey(0)
    k_x, k_w1, k_b1, k_w2, k_b2 = jax.random.split(key, 5)

    # Deterministic parameter init (PyTorch-Linear-style uniform +/- 1/sqrt(fan_in)).
    bound1 = 1.0 / math.sqrt(features_per_step)
    bound2 = 1.0 / math.sqrt(C_new)
    params = {
        "w1": jax.random.uniform(k_w1, (features_per_step, embed_dim),
                                 jnp.float32, -bound1, bound1),
        "b1": jax.random.uniform(k_b1, (1, embed_dim), jnp.float32, -bound1, bound1),
        "w2": jax.random.uniform(k_w2, (C_new, d_new), jnp.float32, -bound2, bound2),
        "b2": jax.random.uniform(k_b2, (1, d_new), jnp.float32, -bound2, bound2),
    }

    x = jax.random.normal(k_x, (B, seq_len, features_per_step), dtype=jnp.float32)

    z = lma_initial_transform_forward(x, params, cfg)
    z = jax.block_until_ready(z)

    z_ref = lma_initial_transform_reference(x, params, cfg)
    assert z.shape == (B, L_new, d_new)
    assert jnp.allclose(z, z_ref, atol=1e-5, rtol=1e-5)

    print("KERNEL_OK")
</pallas_src>

<mosaic_0001>
module attributes {stable_mosaic.version = 11 : i64} {
  func.func @kernel(%arg0: i32, %arg1: memref<2x128xf32, #tpu.memory_space<vmem>>, %arg2: memref<128x256xf32, #tpu.memory_space<vmem>>, %arg3: memref<1x256xf32, #tpu.memory_space<vmem>>, %arg4: memref<1x256xf32, #tpu.memory_space<vmem>>, %arg5: memref<256x512xf32, #tpu.memory_space<vmem>>, %arg6: memref<1x512xf32, #tpu.memory_space<vmem>>, %arg7: memref<2x512xf32, #tpu.memory_space<vmem>>) attributes {dimension_semantics = [#tpu.dimension_semantics<parallel>], iteration_bounds = array<i64: 1>, scalar_prefetch = 0 : i64, scratch_operands = 0 : i64, tpu.core_type = #tpu.core_type<tc>, window_params = [{transform_indices = @transform_0, window_bounds = array<i64: 2, 128>}, {pipeline_mode = #tpu.pipeline_mode<synchronous>, transform_indices = @transform_1, window_bounds = array<i64: 128, 256>}, {pipeline_mode = #tpu.pipeline_mode<synchronous>, transform_indices = @transform_2, window_bounds = array<i64: 1, 256>}, {pipeline_mode = #tpu.pipeline_mode<synchronous>, transform_indices = @transform_3, window_bounds = array<i64: 1, 256>}, {pipeline_mode = #tpu.pipeline_mode<synchronous>, transform_indices = @transform_4, window_bounds = array<i64: 256, 512>}, {pipeline_mode = #tpu.pipeline_mode<synchronous>, transform_indices = @transform_5, window_bounds = array<i64: 1, 512>}, {transform_indices = @transform_6, window_bounds = array<i64: 2, 512>}]} {
    %c0 = arith.constant 0 : index
    %c0_0 = arith.constant 0 : index
    %0 = vector.load %arg1[%c0, %c0_0] : memref<2x128xf32, #tpu.memory_space<vmem>>, vector<2x128xf32>
    %c0_1 = arith.constant 0 : index
    %c0_2 = arith.constant 0 : index
    %1 = vector.load %arg2[%c0_1, %c0_2] : memref<128x256xf32, #tpu.memory_space<vmem>>, vector<128x256xf32>
    %cst = arith.constant dense<0.000000e+00> : vector<2x256xf32>
    %2 = tpu.matmul %0, %1, %cst {dimension_numbers = #tpu.dot_dimension_numbers<[1], [0], [0], [1], [0, 0, 1, 1], [], []>} : vector<2x128xf32>, vector<128x256xf32>, vector<2x256xf32> -> vector<2x256xf32>
    %c0_3 = arith.constant 0 : index
    %c0_4 = arith.constant 0 : index
    %3 = vector.load %arg3[%c0_3, %c0_4] : memref<1x256xf32, #tpu.memory_space<vmem>>, vector<1x256xf32>
    %4 = vector.broadcast %3 : vector<1x256xf32> to vector<2x256xf32>
    %5 = arith.addf %2, %4 : vector<2x256xf32>
    %cst_5 = arith.constant 0.000000e+00 : f32
    %6 = vector.broadcast %cst_5 : f32 to vector<2x256xf32>
    %7 = arith.maximumf %5, %6 : vector<2x256xf32>
    %c0_6 = arith.constant 0 : index
    %c0_7 = arith.constant 0 : index
    %8 = vector.load %arg4[%c0_6, %c0_7] : memref<1x256xf32, #tpu.memory_space<vmem>>, vector<1x256xf32>
    %9 = vector.broadcast %8 : vector<1x256xf32> to vector<2x256xf32>
    %10 = arith.addf %7, %9 : vector<2x256xf32>
    %c0_8 = arith.constant 0 : index
    %c0_9 = arith.constant 0 : index
    %11 = vector.load %arg5[%c0_8, %c0_9] : memref<256x512xf32, #tpu.memory_space<vmem>>, vector<256x512xf32>
    %cst_10 = arith.constant dense<0.000000e+00> : vector<2x512xf32>
    %12 = tpu.matmul %10, %11, %cst_10 {dimension_numbers = #tpu.dot_dimension_numbers<[1], [0], [0], [1], [0, 0, 1, 1], [], []>} : vector<2x256xf32>, vector<256x512xf32>, vector<2x512xf32> -> vector<2x512xf32>
    %c0_11 = arith.constant 0 : index
    %c0_12 = arith.constant 0 : index
    %13 = vector.load %arg6[%c0_11, %c0_12] : memref<1x512xf32, #tpu.memory_space<vmem>>, vector<1x512xf32>
    %14 = vector.broadcast %13 : vector<1x512xf32> to vector<2x512xf32>
    %15 = arith.addf %12, %14 : vector<2x512xf32>
    %cst_13 = arith.constant 0.000000e+00 : f32
    %16 = vector.broadcast %cst_13 : f32 to vector<2x512xf32>
    %17 = arith.maximumf %15, %16 : vector<2x512xf32>
    %c0_14 = arith.constant 0 : index
    %c0_15 = arith.constant 0 : index
    %18 = vector.load %arg7[%c0_14, %c0_15] : memref<2x512xf32, #tpu.memory_space<vmem>>, vector<2x512xf32>
    tpu.vector_store %arg7[%c0_14, %c0_15], %17 {strides = array<i32>} : memref<2x512xf32, #tpu.memory_space<vmem>>, vector<2x512xf32>,
    return
  }
  func.func @transform_0(%arg0: i32) -> (i32, i32) {
    %c0_i32 = arith.constant 0 : i32
    %c0_i32_0 = arith.constant 0 : i32
    return %arg0, %c0_i32 : i32, i32
  }
  func.func @transform_1(%arg0: i32) -> (i32, i32) {
    %c0_i32 = arith.constant 0 : i32
    %c0_i32_0 = arith.constant 0 : i32
    %c0_i32_1 = arith.constant 0 : i32
    return %c0_i32, %c0_i32_0 : i32, i32
  }
  func.func @transform_2(%arg0: i32) -> (i32, i32) {
    %c0_i32 = arith.constant 0 : i32
    %c0_i32_0 = arith.constant 0 : i32
    %c0_i32_1 = arith.constant 0 : i32
    return %c0_i32, %c0_i32_0 : i32, i32
  }
  func.func @transform_3(%arg0: i32) -> (i32, i32) {
    %c0_i32 = arith.constant 0 : i32
    %c0_i32_0 = arith.constant 0 : i32
    %c0_i32_1 = arith.constant 0 : i32
    return %c0_i32, %c0_i32_0 : i32, i32
  }
  func.func @transform_4(%arg0: i32) -> (i32, i32) {
    %c0_i32 = arith.constant 0 : i32
    %c0_i32_0 = arith.constant 0 : i32
    %c0_i32_1 = arith.constant 0 : i32
    return %c0_i32, %c0_i32_0 : i32, i32
  }
  func.func @transform_5(%arg0: i32) -> (i32, i32) {
    %c0_i32 = arith.constant 0 : i32
    %c0_i32_0 = arith.constant 0 : i32
    %c0_i32_1 = arith.constant 0 : i32
    return %c0_i32, %c0_i32_0 : i32, i32
  }
  func.func @transform_6(%arg0: i32) -> (i32, i32) {
    %c0_i32 = arith.constant 0 : i32
    %c0_i32_0 = arith.constant 0 : i32
    return %arg0, %c0_i32 : i32, i32
  }
}

</mosaic_0001>

<bundles_post_ra>
// kernel: tpu_custom_call.1
= control target key start
LH: loop header
LB: loop body
LE: loop exit
PB: predicated region body
PF: predicated region fallthrough
CT: control target
= control target key end

     0   :  { %11 = vsyncpa [#allocation3], 0  ;;  %s896_s0 = inlined_call_operand.hbm [shape: f32[2,128], index: 0, kind: input, shape index: {}]   ;;  %s897_s1 = inlined_call_operand.hbm [shape: f32[128,256], index: 1, kind: input, shape index: {}]   ;;  %s898_s2 = inlined_call_operand.vmem [shape: f32[1,256], index: 2, kind: input, shape index: {}]   ;;  %s899_s3 = inlined_call_operand.vmem [shape: f32[1,256], index: 3, kind: input, shape index: {}]   ;;  %s900_s4 = inlined_call_operand.hbm [shape: f32[256,512], index: 4, kind: input, shape index: {}]   ;;  %s901_s5 = inlined_call_operand.vmem [shape: f32[1,512], index: 5, kind: input, shape index: {}]   ;;  %s902_s6 = inlined_call_operand.hbm [shape: f32[2,512], index: 6, kind: output, shape index: {}]  }
   0x1   :  { %12 = vsyncpa [#allocation6], 0 }
   0x2   :  { %13 = vsyncpa [#allocation4], 0  ;;  %s794_s21 = smov [#allocation5]   ;;  %s700_s25 = scalar_lea.hbm %s897_s1, 4096 }
   0x3   :  { %s29_s22 = sshll.u32 %s794_s21, 4  ;;  %p701_p0 = scmp.ne.s32.totalorder %s897_s1, %s700_s25  ;;  %s30_s22 = int_to_ptr.vmem [resolvable:$true] %s29_s22 }
   0x4   :  { %p704_p1 = scmp.lt.u32.totalorder %s700_s25, %s897_s1 }
   0x6   :  { %p706_p2 = pnand %p704_p1, %p701_p0 }
   0x8   :  { %709 = shalt.err (!%p706_p2)
}
   0x9   :  { %s710_s30 = scalar_lea.vmem %s30_s22, 4096  ;;  %p715_p4 = scmp.lt.s32.totalorder %s30_s22, %s30_s22 }
   0xa   :  { %p711_p3 = scmp.ne.s32.totalorder %s30_s22, %s710_s30  ;;  %p716_p5 = scmp.lt.s32.totalorder %s710_s30, %s710_s30 }
   0xc   :  { %p717_p6 = por %p716_p5, %p715_p4 }
   0xe   :  { %p718_p7 = pnand %p717_p6, %p711_p3 }
  0x10   :  { %721 = shalt.err (!%p718_p7)
}
  0x11   :  { %s795_s7 = smov 256   ;;  %s796_s8 = smov 16  }
  0x12   :  { %35 = dma.hbm_to_vmem [thread:$0]  %s897_s1, 4096, %s30_s22, [#allocation6], %s795_s7, %s795_s7, %s796_s8  }
  0x13   :  { %s797_s11 = smov [#allocation2]   ;;  %s798_s13 = smov [#allocation7]  }
  0x14   :  { %s20_s12 = sshll.u32 %s797_s11, 4  ;;  %s45_s14 = sshll.u32 %s798_s13, 4  ;;  %s21_s12 = int_to_ptr.vmem [resolvable:$true] %s20_s12  ;;  %s46_s14 = int_to_ptr.vmem [resolvable:$true] %s45_s14 }
  0x15   :  { %s722_s17 = scalar_lea.hbm %s896_s0, 32 }
  0x16   :  { %p723_p8 = scmp.ne.s32.totalorder %s896_s0, %s722_s17  ;;  %p726_p9 = scmp.lt.u32.totalorder %s722_s17, %s896_s0 }
  0x18   :  { %p728_p10 = pnand %p726_p9, %p723_p8 }
  0x1a   :  { %731 = shalt.err (!%p728_p10)
}
  0x1b   :  { %s732_s1 = scalar_lea.vmem %s21_s12, 32  ;;  %p737_p12 = scmp.lt.s32.totalorder %s21_s12, %s21_s12 }
  0x1c   :  { %p733_p11 = scmp.ne.s32.totalorder %s21_s12, %s732_s1  ;;  %p738_p13 = scmp.lt.s32.totalorder %s732_s1, %s732_s1 }
  0x1e   :  { %p739_p0 = por %p738_p13, %p737_p12 }
  0x20   :  { %p740_p1 = pnand %p739_p0, %p733_p11 }
  0x22   :  { %743 = shalt.err (!%p740_p1)
}
  0x23   :  { %23 = dma.hbm_to_vmem [thread:$0]  %s896_s0, 32, %s21_s12, [#allocation3]  }
  0x24   :  { %s744_s26 = scalar_lea.hbm %s900_s4, 16384 }
  0x25   :  { %p745_p2 = scmp.ne.s32.totalorder %s900_s4, %s744_s26  ;;  %p748_p3 = scmp.lt.u32.totalorder %s744_s26, %s900_s4 }
  0x27   :  { %p750_p4 = pnand %p748_p3, %p745_p2 }
  0x29   :  { %753 = shalt.err (!%p750_p4)
}
  0x2a   :  { %s754_s7 = scalar_lea.vmem %s46_s14, 16384  ;;  %p759_p6 = scmp.lt.s32.totalorder %s46_s14, %s46_s14 }
  0x2b   :  { %p755_p5 = scmp.ne.s32.totalorder %s46_s14, %s754_s7  ;;  %p760_p7 = scmp.lt.s32.totalorder %s754_s7, %s754_s7 }
  0x2d   :  { %p761_p8 = por %p760_p7, %p759_p6 }
  0x2f   :  { %p762_p9 = pnand %p761_p8, %p755_p5 }
  0x31   :  { %765 = shalt.err (!%p762_p9)
}
  0x32   :  { %s799_s0 = smov 512   ;;  %s800_s8 = smov 32  }
  0x33   :  { %51 = dma.hbm_to_vmem [thread:$0]  %s900_s4, 16384, %s46_s14, [#allocation6], %s799_s0, %s799_s0, %s800_s8  }
  0x34   :  { %788 = dma.done.wait [#allocation3], 32  }
  0x35   :  { %789 = vsyncadd [#allocation3], 4294967264 }
  0x36   :  { %790 = dma.done.wait [#allocation6], 20480  }
  0x37   :  { %791 = vsyncadd [#allocation6], 4294946816  ;;  %v801_v0 = vmov 0.0   ;;  %v65_v1 = vld [vmem:[#allocation5 + $0x8] sm:$0xff]  ;;  %v67_v2 = vld [vmem:[#allocation5 + $0x18] sm:$0xff] }
  0x38   :  { %172 = vmatprep.mubr.f32.mxu0 %v801_v0  ;;  %v64_v3 = vld [vmem:[#allocation5] sm:$0xff]  ;;  %v530_v4 = vpack.c.bf16 %v67_v2, %v65_v1  ;;  %v66_v5 = vld [vmem:[#allocation5 + $0x10] sm:$0xff]  ;;  %v69_v6 = vld [vmem:[#allocation5 + $0x28] sm:$0xff] }
  0x39   :  { %v71_v7 = vld [vmem:[#allocation5 + $0x38] sm:$0xff]  ;;  %v532_v8 = vpack.c.bf16 %v66_v5, %v64_v3  ;;  %v68_v10 = vld [vmem:[#allocation5 + $0x20] sm:$0xff]  ;;  %v70_v11 = vld [vmem:[#allocation5 + $0x30] sm:$0xff] }
  0x3a   :  { %v534_v9 = vpack.c.bf16 %v71_v7, %v69_v6  ;;  %v73_v12 = vld [vmem:[#allocation5 + $0x48] sm:$0xff]  ;;  %531 = vmatprep.subr.bf16.mxu0 %v530_v4  ;;  %v75_v13 = vld [vmem:[#allocation5 + $0x58] sm:$0xff]  ;;  %v536_v14 = vpack.c.bf16 %v70_v11, %v68_v10  ;;  %v72_v16 = vld [vmem:[#allocation5 + $0x40] sm:$0xff] }
  0x3b   :  { %533 = vmatpush1.bf16.msra.mxu0 %v532_v8  ;;  %v538_v15 = vpack.c.bf16 %v75_v13, %v73_v12  ;;  %v74_v17 = vld [vmem:[#allocation5 + $0x50] sm:$0xff]  ;;  %v77_v18 = vld [vmem:[#allocation5 + $0x68] sm:$0xff]  ;;  %v79_v19 = vld [vmem:[#allocation5 + $0x78] sm:$0xff] }
  0x3c   :  { %535 = vmatprep.subr.bf16.mxu0 %v534_v9  ;;  %v540_v20 = vpack.c.bf16 %v74_v17, %v72_v16  ;;  %v542_v21 = vpack.c.bf16 %v79_v19, %v77_v18  ;;  %v76_v22 = vld [vmem:[#allocation5 + $0x60] sm:$0xff]  ;;  %v78_v23 = vld [vmem:[#allocation5 + $0x70] sm:$0xff]  ;;  %v81_v24 = vld [vmem:[#allocation5 + $0x88] sm:$0xff] }
  0x3d   :  { %v83_v25 = vld [vmem:[#allocation5 + $0x98] sm:$0xff]  ;;  %v196_v26 = vld [vmem:[#allocation7 + $0x8] sm:$0xff]  ;;  %v544_v28 = vpack.c.bf16 %v78_v23, %v76_v22  ;;  %v195_v30 = vld [vmem:[#allocation7] sm:$0xff] }
  0x3e   :  { %v200_v27 = vld [vmem:[#allocation7 + $0x28] sm:$0xff]  ;;  %v199_v31 = vld [vmem:[#allocation7 + $0x20] sm:$0xff]  ;;  %v546_v32 = vpack.c.bf16 %v83_v25, %v81_v24  ;;  %v82_v34 = vld [vmem:[#allocation5 + $0x90] sm:$0xff] }
  0x3f   :  { %537 = vmatpush1.bf16.msra.mxu0 %v536_v14  ;;  %v562_v29 = vpack.c.bf16 %v200_v27, %v196_v26  ;;  %v80_v33 = vld [vmem:[#allocation5 + $0x80] sm:$0xff]  ;;  %v564_v35 = vpack.c.bf16 %v199_v31, %v195_v30  ;;  %v204_v36 = vld [vmem:[#allocation7 + $0x48] sm:$0xff]  ;;  %v87_v38 = vld [vmem:[#allocation5 + $0xb8] sm:$0xff] }
  0x40   :  { %539 = vmatprep.subr.bf16.mxu0 %v538_v15  ;;  %v85_v37 = vld [vmem:[#allocation5 + $0xa8] sm:$0xff]  ;;  %v203_v41 = vld [vmem:[#allocation7 + $0x40] sm:$0xff]  ;;  %v548_v43 = vpack.c.bf16 %v82_v34, %v80_v33  ;;  %v86_v49 = vld [vmem:[#allocation5 + $0xb0] sm:$0xff] }
  0x41   :  { %563 = vmatprep.subr.bf16.mxu1 %v562_v29  ;;  %v208_v39 = vld [vmem:[#allocation7 + $0x68] sm:$0xff]  ;;  %v207_v42 = vld [vmem:[#allocation7 + $0x60] sm:$0xff]  ;;  %v550_v47 = vpack.c.bf16 %v87_v38, %v85_v37  ;;  %v91_v53 = vld [vmem:[#allocation5 + $0xd8] sm:$0xff] }
  0x42   :  { %565 = vmatpush1.bf16.msra.mxu1 %v564_v35  ;;  %v566_v40 = vpack.c.bf16 %v208_v39, %v204_v36  ;;  %v568_v44 = vpack.c.bf16 %v207_v42, %v203_v41  ;;  %v212_v45 = vld [vmem:[#allocation7 + $0x88] sm:$0xff]  ;;  %v84_v48 = vld [vmem:[#allocation5 + $0xa0] sm:$0xff]  ;;  %v90_v0 = vld [vmem:[#allocation5 + $0xd0] sm:$0xff] }
  0x43   :  { %541 = vmatpush1.bf16.msra.mxu0 %v540_v20  ;;  %v216_v46 = vld [vmem:[#allocation7 + $0xa8] sm:$0xff]  ;;  %v211_v51 = vld [vmem:[#allocation7 + $0x80] sm:$0xff]  ;;  %v552_v58 = vpack.c.bf16 %v86_v49, %v84_v48  ;;  %v95_v3 = vld [vmem:[#allocation5 + $0xf8] sm:$0xff] }
  0x44   :  { %543 = vmatprep.subr.bf16.mxu0 %v542_v21  ;;  %567 = vmatprep.subr.bf16.mxu1 %v566_v40  ;;  %v570_v50 = vpack.c.bf16 %v216_v46, %v212_v45  ;;  %v89_v52 = vld [vmem:[#allocation5 + $0xc8] sm:$0xff]  ;;  %v215_v54 = vld [vmem:[#allocation7 + $0xa0] sm:$0xff]  ;;  %v94_v12 = vld [vmem:[#allocation5 + $0xf0] sm:$0xff] }
  0x45   :  { %v572_v55 = vpack.c.bf16 %v215_v54, %v211_v51  ;;  %v220_v56 = vld [vmem:[#allocation7 + $0xc8] sm:$0xff]  ;;  %v219_v60 = vld [vmem:[#allocation7 + $0xc0] sm:$0xff]  ;;  %v554_v62 = vpack.c.bf16 %v91_v53, %v89_v52  ;;  %v198_v15 = vld [vmem:[#allocation7 + $0x18] sm:$0xff] }
  0x46   :  { %569 = vmatpush1.bf16.msra.mxu1 %v568_v44  ;;  %v224_v57 = vld [vmem:[#allocation7 + $0xe8] sm:$0xff]  ;;  %v223_v61 = vld [vmem:[#allocation7 + $0xe0] sm:$0xff]  ;;  %v202_v16 = vld [vmem:[#allocation7 + $0x38] sm:$0xff] }
  0x47   :  { %545 = vmatpush1.bf16.msra.mxu0 %v544_v28  ;;  %571 = vmatprep.subr.bf16.mxu1 %v570_v50  ;;  %v574_v59 = vpack.c.bf16 %v224_v57, %v220_v56  ;;  %v88_v63 = vld [vmem:[#allocation5 + $0xc0] sm:$0xff]  ;;  %v228_v1 = vld [vmem:[#allocation7 + $0x108] sm:$0xff]  ;;  %v576_v5 = vpack.c.bf16 %v223_v61, %v219_v60  ;;  %v197_v19 = vld [vmem:[#allocation7 + $0x10] sm:$0xff]  ;;  %v626_v23 = vpack.c.bf16 %v202_v16, %v198_v15 }
  0x48   :  { %547 = vmatprep.subr.bf16.mxu0 %v546_v32  ;;  %v93_v2 = vld [vmem:[#allocation5 + $0xe8] sm:$0xff]  ;;  %v556_v6 = vpack.c.bf16 %v90_v0, %v88_v63  ;;  %v92_v7 = vld [vmem:[#allocation5 + $0xe0] sm:$0xff]  ;;  %v201_v24 = vld [vmem:[#allocation7 + $0x30] sm:$0xff] }
  0x49   :  { %v232_v4 = vld [vmem:[#allocation7 + $0x128] sm:$0xff]  ;;  %v227_v9 = vld [vmem:[#allocation7 + $0x100] sm:$0xff]  ;;  %v558_v11 = vpack.c.bf16 %v95_v3, %v93_v2  ;;  %v560_v18 = vpack.c.bf16 %v94_v12, %v92_v7  ;;  %v206_v27 = vld [vmem:[#allocation7 + $0x58] sm:$0xff]  ;;  %v628_v31 = vpack.c.bf16 %v201_v24, %v197_v19 }
  0x4a   :  { %573 = vmatpush1.bf16.msra.mxu1 %v572_v55  ;;  %v578_v8 = vpack.c.bf16 %v232_v4, %v228_v1  ;;  %v231_v10 = vld [vmem:[#allocation7 + $0x120] sm:$0xff]  ;;  %v236_v13 = vld [vmem:[#allocation7 + $0x148] sm:$0xff]  ;;  %v210_v28 = vld [vmem:[#allocation7 + $0x78] sm:$0xff] }
  0x4b   :  { %549 = vmatpush1.bf16.msra.mxu0 %v548_v43  ;;  %575 = vmatprep.subr.bf16.mxu1 %v574_v59  ;;  %v240_v14 = vld [vmem:[#allocation7 + $0x168] sm:$0xff]  ;;  %v580_v17 = vpack.c.bf16 %v231_v10, %v227_v9  ;;  %v235_v21 = vld [vmem:[#allocation7 + $0x140] sm:$0xff]  ;;  %v63_v29 = vld [vmem:[#allocation2] sm:$0x3]  ;;  %v630_v36 = vpack.c.bf16 %v210_v28, %v206_v27 }
  0x4c   :  { %551 = vmatprep.subr.bf16.mxu0 %v550_v47  ;;  %v582_v20 = vpack.c.bf16 %v240_v14, %v236_v13  ;;  %v239_v22 = vld [vmem:[#allocation7 + $0x160] sm:$0xff]  ;;  %v244_v25 = vld [vmem:[#allocation7 + $0x188] sm:$0xff]  ;;  %v205_v32 = vld [vmem:[#allocation7 + $0x50] sm:$0xff] }
  0x4d   :  { %v248_v26 = vld [vmem:[#allocation7 + $0x1a8] sm:$0xff]  ;;  %v584_v30 = vpack.c.bf16 %v239_v22, %v235_v21  ;;  %v243_v34 = vld [vmem:[#allocation7 + $0x180] sm:$0xff]  ;;  %v209_v37 = vld [vmem:[#allocation7 + $0x70] sm:$0xff] }
  0x4e   :  { %577 = vmatpush1.bf16.msra.mxu1 %v576_v5  ;;  %v586_v33 = vpack.c.bf16 %v248_v26, %v244_v25  ;;  %v247_v35 = vld [vmem:[#allocation7 + $0x1a0] sm:$0xff]  ;;  %v252_v38 = vld [vmem:[#allocation7 + $0x1c8] sm:$0xff]  ;;  %v214_v40 = vld [vmem:[#allocation7 + $0x98] sm:$0xff]  ;;  %v632_v43 = vpack.c.bf16 %v209_v37, %v205_v32 }
  0x4f   :  { %553 = vmatpush1.bf16.msra.mxu0 %v552_v58  ;;  %579 = vmatprep.subr.bf16.mxu1 %v578_v8  ;;  %v256_v39 = vld [vmem:[#allocation7 + $0x1e8] sm:$0xff]  ;;  %v218_v41 = vld [vmem:[#allocation7 + $0xb8] sm:$0xff]  ;;  %v588_v42 = vpack.c.bf16 %v247_v35, %v243_v34  ;;  %v213_v44 = vld [vmem:[#allocation7 + $0x90] sm:$0xff] }
  0x50   :  { %555 = vmatprep.subr.bf16.mxu0 %v554_v62  ;;  %v590_v45 = vpack.c.bf16 %v256_v39, %v252_v38  ;;  %v251_v46 = vld [vmem:[#allocation7 + $0x1c0] sm:$0xff]  ;;  %v634_v48 = vpack.c.bf16 %v218_v41, %v214_v40  ;;  %v217_v49 = vld [vmem:[#allocation7 + $0xb0] sm:$0xff]  ;;  %v260_v50 = vld [vmem:[#allocation7 + $0x208] sm:$0xff] }
  0x51   :  { %v255_v47 = vld [vmem:[#allocation7 + $0x1e0] sm:$0xff]  ;;  %v264_v51 = vld [vmem:[#allocation7 + $0x228] sm:$0xff]  ;;  %v222_v52 = vld [vmem:[#allocation7 + $0xd8] sm:$0xff]  ;;  %v636_v55 = vpack.c.bf16 %v217_v49, %v213_v44 }
  0x52   :  { %581 = vmatpush1.bf16.msra.mxu1 %v580_v17  ;;  %v226_v53 = vld [vmem:[#allocation7 + $0xf8] sm:$0xff]  ;;  %v592_v54 = vpack.c.bf16 %v255_v47, %v251_v46  ;;  %v221_v56 = vld [vmem:[#allocation7 + $0xd0] sm:$0xff]  ;;  %v594_v57 = vpack.c.bf16 %v264_v51, %v260_v50  ;;  %v259_v58 = vld [vmem:[#allocation7 + $0x200] sm:$0xff] }
  0x53   :  { %557 = vmatpush1.bf16.msra.mxu0 %v556_v6  ;;  %583 = vmatprep.subr.bf16.mxu1 %v582_v20  ;;  %v263_v59 = vld [vmem:[#allocation7 + $0x220] sm:$0xff]  ;;  %v638_v60 = vpack.c.bf16 %v226_v53, %v222_v52  ;;  %v225_v61 = vld [vmem:[#allocation7 + $0xf0] sm:$0xff]  ;;  %v268_v62 = vld [vmem:[#allocation7 + $0x248] sm:$0xff] }
  0x54   :  { %559 = vmatprep.subr.bf16.mxu0 %v558_v11  ;;  %v272_v63 = vld [vmem:[#allocation7 + $0x268] sm:$0xff]  ;;  %v230_v0 = vld [vmem:[#allocation7 + $0x118] sm:$0xff]  ;;  %v596_v2 = vpack.c.bf16 %v263_v59, %v259_v58  ;;  %v640_v3 = vpack.c.bf16 %v225_v61, %v221_v56  ;;  %v229_v4 = vld [vmem:[#allocation7 + $0x110] sm:$0xff] }
  0x55   :  { %v234_v1 = vld [vmem:[#allocation7 + $0x138] sm:$0xff]  ;;  %v598_v5 = vpack.c.bf16 %v272_v63, %v268_v62  ;;  %v267_v6 = vld [vmem:[#allocation7 + $0x240] sm:$0xff]  ;;  %v233_v9 = vld [vmem:[#allocation7 + $0x130] sm:$0xff] }
  0x56   :  { %585 = vmatpush1.bf16.msra.mxu1 %v584_v30  ;;  %v271_v7 = vld [vmem:[#allocation7 + $0x260] sm:$0xff]  ;;  %v642_v8 = vpack.c.bf16 %v234_v1, %v230_v0  ;;  %v276_v10 = vld [vmem:[#allocation7 + $0x288] sm:$0xff]  ;;  %v238_v12 = vld [vmem:[#allocation7 + $0x158] sm:$0xff]  ;;  %v644_v15 = vpack.c.bf16 %v233_v9, %v229_v4 }
  0x57   :  { %561 = vmatpush1.bf16.msra.mxu0 %v560_v18  ;;  %587 = vmatprep.subr.bf16.mxu1 %v586_v33  ;;  %v280_v11 = vld [vmem:[#allocation7 + $0x2a8] sm:$0xff]  ;;  %v242_v13 = vld [vmem:[#allocation7 + $0x178] sm:$0xff]  ;;  %v600_v14 = vpack.c.bf16 %v271_v7, %v267_v6  ;;  %v237_v16 = vld [vmem:[#allocation7 + $0x150] sm:$0xff] }
  0x58   :  { %627 = vmatprep.subr.bf16.mxu0 %v626_v23  ;;  %v602_v17 = vpack.c.bf16 %v280_v11, %v276_v10  ;;  %v275_v18 = vld [vmem:[#allocation7 + $0x280] sm:$0xff]  ;;  %v646_v20 = vpack.c.bf16 %v242_v13, %v238_v12  ;;  %v241_v21 = vld [vmem:[#allocation7 + $0x170] sm:$0xff]  ;;  %v284_v22 = vld [vmem:[#allocation7 + $0x2c8] sm:$0xff] }
  0x59   :  { %v279_v19 = vld [vmem:[#allocation7 + $0x2a0] sm:$0xff]  ;;  %v288_v23 = vld [vmem:[#allocation7 + $0x2e8] sm:$0xff]  ;;  %v246_v24 = vld [vmem:[#allocation7 + $0x198] sm:$0xff]  ;;  %v648_v27 = vpack.c.bf16 %v241_v21, %v237_v16 }
  0x5a   :  { %173 = vmatmul.mubr.f32.vlgmr.msra.gmra.mrb[0].mxu0 %v63_v29  ;;  %589 = vmatpush1.bf16.msra.mxu1 %v588_v42  ;;  %v250_v25 = vld [vmem:[#allocation7 + $0x1b8] sm:$0xff]  ;;  %v604_v26 = vpack.c.bf16 %v279_v19, %v275_v18  ;;  %v245_v28 = vld [vmem:[#allocation7 + $0x190] sm:$0xff]  ;;  %v606_v29 = vpack.c.bf16 %v288_v23, %v284_v22  ;;  %v283_v30 = vld [vmem:[#allocation7 + $0x2c0] sm:$0xff] }
  0x5b   :  { %629 = vmatpush1.bf16.msra.mxu0 %v628_v31  ;;  %591 = vmatprep.subr.bf16.mxu1 %v590_v45  ;;  %v287_v31 = vld [vmem:[#allocation7 + $0x2e0] sm:$0xff]  ;;  %v650_v32 = vpack.c.bf16 %v250_v25, %v246_v24  ;;  %v249_v33 = vld [vmem:[#allocation7 + $0x1b0] sm:$0xff]  ;;  %v292_v34 = vld [vmem:[#allocation7 + $0x308] sm:$0xff] }
  0x5c   :  { %631 = vmatprep.subr.bf16.mxu0 %v630_v36  ;;  %v296_v35 = vld [vmem:[#allocation7 + $0x328] sm:$0xff]  ;;  %v254_v36 = vld [vmem:[#allocation7 + $0x1d8] sm:$0xff]  ;;  %v608_v38 = vpack.c.bf16 %v287_v31, %v283_v30  ;;  %v652_v39 = vpack.c.bf16 %v249_v33, %v245_v28  ;;  %v253_v40 = vld [vmem:[#allocation7 + $0x1d0] sm:$0xff] }
  0x5d   :  { %v258_v37 = vld [vmem:[#allocation7 + $0x1f8] sm:$0xff]  ;;  %v610_v41 = vpack.c.bf16 %v296_v35, %v292_v34  ;;  %v291_v42 = vld [vmem:[#allocation7 + $0x300] sm:$0xff]  ;;  %v257_v45 = vld [vmem:[#allocation7 + $0x1f0] sm:$0xff] }
  0x5e   :  { %593 = vmatpush1.bf16.msra.mxu1 %v592_v54  ;;  %v654_v44 = vpack.c.bf16 %v258_v37, %v254_v36  ;;  %v300_v46 = vld [vmem:[#allocation7 + $0x348] sm:$0xff]  ;;  %v266_v49 = vld [vmem:[#allocation7 + $0x238] sm:$0xff]  ;;  %v656_v51 = vpack.c.bf16 %v257_v45, %v253_v40  ;;  %v299_v53 = vld [vmem:[#allocation7 + $0x340] sm:$0xff] }
  0x5f   :  { %633 = vmatpush1.bf16.msra.mxu0 %v632_v43  ;;  %595 = vmatprep.subr.bf16.mxu1 %v594_v57  ;;  %v295_v43 = vld [vmem:[#allocation7 + $0x320] sm:$0xff]  ;;  %v304_v47 = vld [vmem:[#allocation7 + $0x368] sm:$0xff]  ;;  %v261_v56 = vld [vmem:[#allocation7 + $0x210] sm:$0xff] }
  0x60   :  { %635 = vmatprep.subr.bf16.mxu0 %v634_v48  ;;  %v262_v48 = vld [vmem:[#allocation7 + $0x218] sm:$0xff]  ;;  %v612_v50 = vpack.c.bf16 %v295_v43, %v291_v42  ;;  %v614_v52 = vpack.c.bf16 %v304_v47, %v300_v46  ;;  %v303_v54 = vld [vmem:[#allocation7 + $0x360] sm:$0xff]  ;;  %v265_v57 = vld [vmem:[#allocation7 + $0x230] sm:$0xff] }
  0x61   :  { %v270_v58 = vld [vmem:[#allocation7 + $0x258] sm:$0xff]  ;;  %v660_v61 = vpack.c.bf16 %v265_v57, %v261_v56  ;;  %v269_v63 = vld [vmem:[#allocation7 + $0x250] sm:$0xff]  ;;  %v307_v31 = vld [vmem:[#allocation7 + $0x380] sm:$0xff] }
  0x62   :  { %597 = vmatpush1.bf16.msra.mxu1 %v596_v2  ;;  %v274_v59 = vld [vmem:[#allocation7 + $0x278] sm:$0xff]  ;;  %v273_v0 = vld [vmem:[#allocation7 + $0x270] sm:$0xff]  ;;  %v315_v43 = vld [vmem:[#allocation7 + $0x3c0] sm:$0xff] }
  0x63   :  { %637 = vmatpush1.bf16.msra.mxu0 %v636_v55  ;;  %599 = vmatprep.subr.bf16.mxu1 %v598_v5  ;;  %v658_v55 = vpack.c.bf16 %v266_v49, %v262_v48  ;;  %v662_v62 = vpack.c.bf16 %v274_v59, %v270_v58  ;;  %v278_v1 = vld [vmem:[#allocation7 + $0x298] sm:$0xff]  ;;  %v277_v5 = vld [vmem:[#allocation7 + $0x290] sm:$0xff]  ;;  %v319_v45 = vld [vmem:[#allocation7 + $0x3e0] sm:$0xff] }
  0x64   :  { %639 = vmatprep.subr.bf16.mxu0 %v638_v60  ;;  %v616_v60 = vpack.c.bf16 %v303_v54, %v299_v53  ;;  %v282_v2 = vld [vmem:[#allocation7 + $0x2b8] sm:$0xff]  ;;  %v281_v6 = vld [vmem:[#allocation7 + $0x2b0] sm:$0xff]  ;;  %v624_v48 = vpack.c.bf16 %v319_v45, %v315_v43 }
  0x65   :  { %v666_v4 = vpack.c.bf16 %v282_v2, %v278_v1  ;;  %v286_v7 = vld [vmem:[#allocation7 + $0x2d8] sm:$0xff]  ;;  %v668_v9 = vpack.c.bf16 %v281_v6, %v277_v5  ;;  %v285_v11 = vld [vmem:[#allocation7 + $0x2d0] sm:$0xff] }
  0x66   :  { %601 = vmatpush1.bf16.msra.mxu1 %v600_v14  ;;  %v289_v12 = vld [vmem:[#allocation7 + $0x2f0] sm:$0xff]  ;;  %v294_v13 = vld [vmem:[#allocation7 + $0x318] sm:$0xff] }
  0x67   :  { %641 = vmatpush1.bf16.msra.mxu0 %v640_v3  ;;  %603 = vmatprep.subr.bf16.mxu1 %v602_v17  ;;  %v664_v3 = vpack.c.bf16 %v273_v0, %v269_v63  ;;  %v298_v14 = vld [vmem:[#allocation7 + $0x338] sm:$0xff]  ;;  %v293_v17 = vld [vmem:[#allocation7 + $0x310] sm:$0xff] }
  0x68   :  { %643 = vmatprep.subr.bf16.mxu0 %v642_v8  ;;  %v290_v8 = vld [vmem:[#allocation7 + $0x2f8] sm:$0xff]  ;;  %v674_v16 = vpack.c.bf16 %v298_v14, %v294_v13  ;;  %v297_v18 = vld [vmem:[#allocation7 + $0x330] sm:$0xff] }
  0x69   :  { %v670_v10 = vpack.c.bf16 %v290_v8, %v286_v7  ;;  %v302_v19 = vld [vmem:[#allocation7 + $0x358] sm:$0xff]  ;;  %v676_v21 = vpack.c.bf16 %v297_v18, %v293_v17  ;;  %v301_v23 = vld [vmem:[#allocation7 + $0x350] sm:$0xff]  ;;  %v802_v7 = vmov 1983009808  }
  0x6a   :  { %605 = vmatpush1.bf16.msra.mxu1 %v604_v26  ;;  %v305_v24 = vld [vmem:[#allocation7 + $0x370] sm:$0xff]  ;;  %v308_v26 = vld [vmem:[#allocation7 + $0x388] sm:$0xff]  ;;  %v310_v28 = vld [vmem:[#allocation7 + $0x398] sm:$0xff]  ;;  %v498_v8 = vunpack.c.l.s4 %v802_v7 }
  0x6b   :  { %645 = vmatpush1.bf16.msra.mxu0 %v644_v15  ;;  %607 = vmatprep.subr.bf16.mxu1 %v606_v29  ;;  %v672_v15 = vpack.c.bf16 %v289_v12, %v285_v11  ;;  %v680_v25 = vpack.c.bf16 %v305_v24, %v301_v23  ;;  %v314_v30 = vld [vmem:[#allocation7 + $0x3b8] sm:$0xff]  ;;  %v309_v35 = vld [vmem:[#allocation7 + $0x390] sm:$0xff] }
  0x6c   :  { %647 = vmatprep.subr.bf16.mxu0 %v646_v20  ;;  %v306_v20 = vld [vmem:[#allocation7 + $0x378] sm:$0xff]  ;;  %v682_v33 = vpack.c.bf16 %v314_v30, %v310_v28  ;;  %v313_v36 = vld [vmem:[#allocation7 + $0x3b0] sm:$0xff] }
  0x6d   :  { %v678_v22 = vpack.c.bf16 %v306_v20, %v302_v19  ;;  %v684_v37 = vpack.c.bf16 %v313_v36, %v309_v35  ;;  %v322_v42 = vld [vmem:[#allocation7 + $0x3f8] sm:$0xff]  ;;  %v317_v46 = vld [vmem:[#allocation7 + $0x3d0] sm:$0xff] }
  0x6e   :  { %609 = vmatpush1.bf16.msra.mxu1 %v608_v38  ;;  %v316_v38 = vld [vmem:[#allocation7 + $0x3c8] sm:$0xff]  ;;  %v321_v47 = vld [vmem:[#allocation7 + $0x3f0] sm:$0xff] }
  0x6f   :  { %649 = vmatpush1.bf16.msra.mxu0 %v648_v27  ;;  %611 = vmatprep.subr.bf16.mxu1 %v610_v41  ;;  %v312_v27 = vld [vmem:[#allocation7 + $0x3a8] sm:$0xff]  ;;  %v318_v41 = vld [vmem:[#allocation7 + $0x3d8] sm:$0xff]  ;;  %v688_v49 = vpack.c.bf16 %v321_v47, %v317_v46  ;;  %v96_v53 = vld [vmem:[%s898_s2] sm:$0x3] }
  0x70   :  { %651 = vmatprep.subr.bf16.mxu0 %v650_v32  ;;  %v618_v29 = vpack.c.bf16 %v312_v27, %v308_v26  ;;  %v311_v32 = vld [vmem:[#allocation7 + $0x3a0] sm:$0xff]  ;;  %v181_v57 = vld [vmem:[%s899_s3] sm:$0x3]  ;;  %s803_s3 = smov [#allocation8]  }
  0x71   :  { %v620_v34 = vpack.c.bf16 %v311_v32, %v307_v31  ;;  %v323_v5 = vld [vmem:[%s901_s5] sm:$0xf]  ;;  %s520_s5 = sshll.u32 %s803_s3, 4  ;;  %s521_s5 = int_to_ptr.vmem [resolvable:$true] %s520_s5 }
  0x72   :  { %613 = vmatpush1.bf16.msra.mxu1 %v612_v50  ;;  %v98_v50 = vlaneseq  ;;  %s766_s15 = scalar_lea.vmem %s521_s5, 128  ;;  %p771_p11 = scmp.lt.s32.totalorder %s521_s5, %s521_s5 }
  0x73   :  { %653 = vmatpush1.bf16.msra.mxu0 %v652_v39  ;;  %615 = vmatprep.subr.bf16.mxu1 %v614_v52  ;;  %v320_v39 = vld [vmem:[#allocation7 + $0x3e8] sm:$0xff]  ;;  %p767_p10 = scmp.ne.s32.totalorder %s521_s5, %s766_s15  ;;  %p772_p12 = scmp.lt.s32.totalorder %s766_s15, %s766_s15 }
  0x74   :  { %655 = vmatprep.subr.bf16.mxu0 %v654_v44  ;;  %v622_v40 = vpack.c.bf16 %v320_v39, %v316_v38  ;;  %v686_v44 = vpack.c.bf16 %v322_v42, %v318_v41 }
  0x75   :  { %p773_p13 = por %p772_p12, %p771_p11 }
  0x76   :  { %617 = vmatpush1.bf16.msra.mxu1 %v616_v60 }
  0x77   :  { %657 = vmatpush1.bf16.msra.mxu0 %v656_v51  ;;  %619 = vmatprep.subr.bf16.mxu1 %v618_v29  ;;  %v99_v51 = vshrl.u32 %v98_v50, 7  ;;  %p774_p0 = pnand %p773_p13, %p767_p10 }
  0x78   :  { %659 = vmatprep.subr.bf16.mxu0 %v658_v55 }
  0x79   :  { %v100_v52 = vsub.s32 0, %v99_v51  ;;  %v104_v54 = vsub.s32 1, %v99_v51  ;;  %v339_v6 = vsub.s32 3, %v99_v51 }
  0x7a   :  { %621 = vmatpush1.bf16.msra.mxu1 %v620_v34 }
  0x7b   :  { %661 = vmatpush1.bf16.msra.mxu0 %v660_v61  ;;  %623 = vmatprep.subr.bf16.mxu1 %v622_v40  ;;  %v101_v55 = vrot.slane %v96_v53, %v100_v52  ;;  %v105_v56 = vrot.slane %v96_v53, %v104_v54  ;;  %v186_v0 = vrot.slane %v181_v57, %v100_v52 }
  0x7c   :  { %663 = vmatprep.subr.bf16.mxu0 %v662_v62  ;;  %v190_v62 = vrot.slane %v181_v57, %v104_v54  ;;  %v332_v11 = vrot.slane %v323_v5, %v104_v54  ;;  %v340_v12 = vrot.slane %v323_v5, %v339_v6 }
  0x7e   :  { %625 = vmatpush1.bf16.msra.mxu1 %v624_v48 }
  0x7f   :  { %665 = vmatpush1.bf16.msra.mxu0 %v664_v3 }
  0x80   :  { %667 = vmatprep.subr.bf16.mxu0 %v666_v4  ;;  %v335_v4 = vsub.s32 2, %v99_v51 }
  0x83   :  { %669 = vmatpush1.bf16.msra.mxu0 %v668_v9  ;;  %v328_v9 = vrot.slane %v323_v5, %v100_v52 }
  0x84   :  { %671 = vmatprep.subr.bf16.mxu0 %v670_v10  ;;  %v336_v10 = vrot.slane %v323_v5, %v335_v4 }
  0x87   :  { %673 = vmatpush1.bf16.msra.mxu0 %v672_v15  ;;  %v499_v15 = vunpack.c.0.s8 %v498_v8 }
  0x88   :  { %675 = vmatprep.subr.bf16.mxu0 %v674_v16 }
  0x8b   :  { %677 = vmatpush1.bf16.msra.mxu0 %v676_v21 }
  0x8c   :  { %679 = vmatprep.subr.bf16.mxu0 %v678_v22 }
  0x8f   :  { %681 = vmatpush1.bf16.msra.mxu0 %v680_v25  ;;  %v502_v25 = vsub.s32 %v499_v15, %v99_v51 }
  0x90   :  { %683 = vmatprep.subr.bf16.mxu0 %v682_v33 }
  0x93   :  { %685 = vmatpush1.bf16.msra.mxu0 %v684_v37 }
  0x94   :  { %687 = vmatprep.subr.bf16.mxu0 %v686_v44 }
  0x97   :  { %689 = vmatpush1.bf16.msra.mxu0 %v688_v49 }
 0x12d   :  { %v174_v58 = vpop.f32.mrb[0].mxu0 }
 0x12e   :  { %v175_v59 = vadd.f32 %v174_v58, %v101_v55  ;;  %v176_v60 = vpop.f32.mrb[1].mxu0 }
 0x12f   :  { %v177_v61 = vadd.f32 %v176_v60, %v105_v56 }
 0x130   :  { %v179_v63 = vmax.f32 %v175_v59, 0.0 }
 0x131   :  { %v180_v1 = vmax.f32 %v177_v61, 0.0 }
 0x132   :  { %v193_v3 = vadd.f32 %v186_v0, %v179_v63 }
 0x133   :  { %v194_v2 = vadd.f32 %v190_v62, %v180_v1 }
 0x135   :  { %409 = vmatprep.mubr.f32.mxu1 %v194_v2  ;;  %480 = vmatprep.mubr.f32.mxu0 %v194_v2 }
 0x136   :  { %410 = vmatmul.mubr.f32.vlgmr.msra.gmra.mrb[0].mxu1 %v193_v3  ;;  %481 = vmatmul.mubr.f32.vlgmr.msra.gmra.mrb[2].mxu0 %v193_v3 }
 0x209   :  { %v411_v13 = vpop.f32.mrb[0].mxu1  ;;  %v482_v14 = vpop.f32.mrb[2].mxu0 }
 0x20a   :  { %v412_v16 = vadd.f32 %v411_v13, %v328_v9  ;;  %v483_v17 = vadd.f32 %v482_v14, %v336_v10  ;;  %v413_v18 = vpop.f32.mrb[1].mxu1  ;;  %v484_v19 = vpop.f32.mrb[3].mxu0 }
 0x20b   :  { %v414_v20 = vadd.f32 %v413_v18, %v332_v11  ;;  %v485_v21 = vadd.f32 %v484_v19, %v340_v12 }
 0x20c   :  { %v487_v22 = vmax.f32 %v412_v16, 0.0  ;;  %v489_v23 = vmax.f32 %v483_v17, 0.0 }
 0x20d   :  { %v488_v24 = vmax.f32 %v414_v20, 0.0  ;;  %v490_v26 = vmax.f32 %v485_v21, 0.0 }
 0x20f   :  { %v495_v27 = vcombine.low %v487_v22, %v488_v24  ;;  %v496_v28 = vcombine.low %v489_v23, %v490_v26 }
 0x211   :  { %v503_v29 = vrot.slane %v495_v27, %v502_v25  ;;  %v510_v30 = vrot.slane %v496_v28, %v502_v25 }
 0x213   :  { %v511_v31 = vcombine.low %v503_v29, %v510_v30 }
 0x215   :  { %513 = vst [vmem:[#allocation8] sm:$0xff] %v511_v31 }
 0x216   :  { %777 = shalt.err (!%p774_p0)
}
 0x217   :  { %s778_s18 = scalar_lea.hbm %s902_s6, 128 }
 0x218   :  { %p779_p1 = scmp.ne.s32.totalorder %s902_s6, %s778_s18  ;;  %p782_p2 = scmp.lt.u32.totalorder %s778_s18, %s902_s6 }
 0x21a   :  { %p784_p3 = pnand %p782_p2, %p779_p1 }
 0x21c   :  { %787 = shalt.err (!%p784_p3)
}
 0x21d   :  { %523 = dma.vmem_to_hbm [thread:$0]  %s521_s5, 128, %s902_s6, [#allocation4]  }
 0x21e   :  { %792 = dma.done.wait [#allocation4], 128  }
 0x21f   :  { %793 = vsyncadd [#allocation4], 4294967168 }
 0x220   :  { %527 = vsyncpa [#allocation3], 1 }
 0x221   :  { %528 = vsyncpa [#allocation6], 1 }
 0x222   :  { %529 = vsyncpa [#allocation4], 1 }

</bundles_post_ra>
